<compile_context>
chip_gen: v5e
topology: v5e:2x2
jax: 0.10.0
libtpu: 0.0.40
codegen_flags: <defaults>
</compile_context>

<pallas_src>
import math

import jax
import jax.numpy as jnp
from jax.experimental import pallas as pl
from jax.experimental.pallas import tpu as pltpu

HIDDEN = 256
LANES = 128           # output lane padding target
MAX_BATCH_TILE = 512  # rows per grid step (multiple of 8)


def _mlp_kernel(x_ref, w1_ref, b1_ref, w2_ref, b2_ref, o_ref):
    # First linear on the MXU; f32 accumulation regardless of operand dtype.
    h = jnp.dot(x_ref[...], w1_ref[...], preferred_element_type=jnp.float32)
    # Bias + ReLU in f32 on the VPU (b1 is (1, HIDDEN) -> broadcasts over rows).
    h = jnp.maximum(h + b1_ref[...], 0.0)
    # Second linear on the MXU; match operand dtype of the resident w2 tile
    # (cast is a no-op in the f32 path).
    out = jnp.dot(h.astype(w2_ref.dtype), w2_ref[...],
                  preferred_element_type=jnp.float32)
    out = out + b2_ref[...]  # b2 is (1, n_pad)
    o_ref[...] = out.astype(o_ref.dtype)


def net_forward(x, w1, b1, w2, b2, *, compute_dtype=jnp.float32):
    """Forward pass of Net.

    x:  (B, num_inputs) f32
    w1: (num_inputs, 256) f32, b1: (1, 256) f32
    w2: (256, num_outputs) f32, b2: (1, num_outputs) f32
    Returns (B, num_outputs) f32.

    compute_dtype: dtype of the matmul operands (jnp.float32 or jnp.bfloat16).
    Accumulation / bias / ReLU are always f32.
    """
    B, num_inputs = x.shape
    num_outputs = w2.shape[1]

    # ---- batch tiling: pad B to a multiple of 8 and pick a tile size ----------
    b_pad = pl.cdiv(B, 8) * 8
    tb = min(MAX_BATCH_TILE, b_pad)
    b_pad = pl.cdiv(b_pad, tb) * tb
    if b_pad != B:
        x = jnp.pad(x, ((0, b_pad - B), (0, 0)))

    # ---- lane-dense output: zero-pad the output dim up to a multiple of 128 ---
    n_pad = pl.cdiv(num_outputs, LANES) * LANES
    if n_pad != num_outputs:
        w2 = jnp.pad(w2, ((0, 0), (0, n_pad - num_outputs)))
        b2 = jnp.pad(b2, ((0, 0), (0, n_pad - num_outputs)))

    # ---- operand dtype (bf16 fast path on v6e/v7x; biases stay f32) -----------
    x_c = x.astype(compute_dtype)
    w1_c = w1.astype(compute_dtype)
    w2_c = w2.astype(compute_dtype)
    b1_c = b1.astype(jnp.float32)
    b2_c = b2.astype(jnp.float32)

    grid = (b_pad // tb,)
    itemsize = jnp.dtype(compute_dtype).itemsize
    cost = pl.CostEstimate(
        flops=2 * b_pad * num_inputs * HIDDEN + 2 * b_pad * HIDDEN * n_pad,
        transcendentals=0,
        bytes_accessed=(x_c.size * itemsize + w1_c.size * itemsize
                        + w2_c.size * itemsize + b1_c.size * 4 + b2_c.size * 4
                        + b_pad * n_pad * 4),
    )

    out = pl.pallas_call(
        _mlp_kernel,
        out_shape=jax.ShapeDtypeStruct((b_pad, n_pad), jnp.float32),
        grid_spec=pltpu.PrefetchScalarGridSpec(
            num_scalar_prefetch=0,
            grid=grid,
            in_specs=[
                pl.BlockSpec((tb, num_inputs), lambda i: (i, 0)),      # x streams
                pl.BlockSpec((num_inputs, HIDDEN), lambda i: (0, 0)),  # w1 resident
                pl.BlockSpec((1, HIDDEN), lambda i: (0, 0)),           # b1 resident
                pl.BlockSpec((HIDDEN, n_pad), lambda i: (0, 0)),       # w2 resident
                pl.BlockSpec((1, n_pad), lambda i: (0, 0)),            # b2 resident
            ],
            out_specs=pl.BlockSpec((tb, n_pad), lambda i: (i, 0)),     # lane-dense out
        ),
        compiler_params=pltpu.CompilerParams(
            dimension_semantics=("parallel",),  # v7x: shard batch tiles across TCs
        ),
        cost_estimate=cost,
    )(x_c, w1_c, b1_c, w2_c, b2_c)

    return out[:B, :num_outputs]


def init_net_params(key, num_inputs, num_outputs):
    """Deterministic init mimicking PyTorch nn.Linear default:
    U(-1/sqrt(fan_in), 1/sqrt(fan_in)) for weights and biases."""
    k1, k2, k3, k4 = jax.random.split(key, 4)
    bound1 = 1.0 / math.sqrt(num_inputs)
    bound2 = 1.0 / math.sqrt(HIDDEN)
    w1 = jax.random.uniform(k1, (num_inputs, HIDDEN), jnp.float32, -bound1, bound1)
    b1 = jax.random.uniform(k2, (1, HIDDEN), jnp.float32, -bound1, bound1)
    w2 = jax.random.uniform(k3, (HIDDEN, num_outputs), jnp.float32, -bound2, bound2)
    b2 = jax.random.uniform(k4, (1, num_outputs), jnp.float32, -bound2, bound2)
    return w1, b1, w2, b2


if __name__ == "__main__":
    key = jax.random.PRNGKey(0)
    batch = 2
    num_inputs = 16
    num_outputs = 4

    k_x, k_p = jax.random.split(key)
    x = jax.random.normal(k_x, (batch, num_inputs), jnp.float32)
    w1, b1, w2, b2 = init_net_params(k_p, num_inputs, num_outputs)

    # Pure-JAX reference.
    ref = jnp.maximum(x @ w1 + b1, 0.0) @ w2 + b2

    # f32 path (exact within fp tolerance).
    out_f32 = jax.block_until_ready(
        net_forward(x, w1, b1, w2, b2, compute_dtype=jnp.float32))
    assert out_f32.shape == (batch, num_outputs)
    assert jnp.allclose(out_f32, ref, atol=1e-5, rtol=1e-5)

    # bf16 operand path (v6e/v7x fast path) — looser tolerance.
    out_bf16 = jax.block_until_ready(
        net_forward(x, w1, b1, w2, b2, compute_dtype=jnp.bfloat16))
    assert out_bf16.shape == (batch, num_outputs)
    assert jnp.allclose(out_bf16, ref, atol=1e-1, rtol=1e-1)

    print("KERNEL_OK")
</pallas_src>

<mosaic_0001>
module attributes {stable_mosaic.version = 11 : i64} {
  func.func @_mlp_kernel(%arg0: i32, %arg1: memref<8x16xf32, #tpu.memory_space<vmem>>, %arg2: memref<16x256xf32, #tpu.memory_space<vmem>>, %arg3: memref<1x256xf32, #tpu.memory_space<vmem>>, %arg4: memref<256x128xf32, #tpu.memory_space<vmem>>, %arg5: memref<1x128xf32, #tpu.memory_space<vmem>>, %arg6: memref<8x128xf32, #tpu.memory_space<vmem>>) attributes {dimension_semantics = [#tpu.dimension_semantics<parallel>], iteration_bounds = array<i64: 1>, scalar_prefetch = 0 : i64, scratch_operands = 0 : i64, tpu.core_type = #tpu.core_type<tc>, window_params = [{transform_indices = @transform_0, window_bounds = array<i64: 8, 16>}, {pipeline_mode = #tpu.pipeline_mode<synchronous>, transform_indices = @transform_1, window_bounds = array<i64: 16, 256>}, {pipeline_mode = #tpu.pipeline_mode<synchronous>, transform_indices = @transform_2, window_bounds = array<i64: 1, 256>}, {pipeline_mode = #tpu.pipeline_mode<synchronous>, transform_indices = @transform_3, window_bounds = array<i64: 256, 128>}, {pipeline_mode = #tpu.pipeline_mode<synchronous>, transform_indices = @transform_4, window_bounds = array<i64: 1, 128>}, {transform_indices = @transform_5, window_bounds = array<i64: 8, 128>}]} {
    %c0 = arith.constant 0 : index
    %c0_0 = arith.constant 0 : index
    %0 = vector.load %arg1[%c0, %c0_0] : memref<8x16xf32, #tpu.memory_space<vmem>>, vector<8x16xf32>
    %c0_1 = arith.constant 0 : index
    %c0_2 = arith.constant 0 : index
    %1 = vector.load %arg2[%c0_1, %c0_2] : memref<16x256xf32, #tpu.memory_space<vmem>>, vector<16x256xf32>
    %cst = arith.constant dense<0.000000e+00> : vector<8x256xf32>
    %2 = tpu.matmul %0, %1, %cst {dimension_numbers = #tpu.dot_dimension_numbers<[1], [0], [0], [1], [0, 0, 1, 1], [], []>} : vector<8x16xf32>, vector<16x256xf32>, vector<8x256xf32> -> vector<8x256xf32>
    %c0_3 = arith.constant 0 : index
    %c0_4 = arith.constant 0 : index
    %3 = vector.load %arg3[%c0_3, %c0_4] : memref<1x256xf32, #tpu.memory_space<vmem>>, vector<1x256xf32>
    %4 = vector.broadcast %3 : vector<1x256xf32> to vector<8x256xf32>
    %5 = arith.addf %2, %4 : vector<8x256xf32>
    %cst_5 = arith.constant 0.000000e+00 : f32
    %6 = vector.broadcast %cst_5 : f32 to vector<8x256xf32>
    %7 = arith.maximumf %5, %6 : vector<8x256xf32>
    %c0_6 = arith.constant 0 : index
    %c0_7 = arith.constant 0 : index
    %8 = vector.load %arg4[%c0_6, %c0_7] : memref<256x128xf32, #tpu.memory_space<vmem>>, vector<256x128xf32>
    %cst_8 = arith.constant dense<0.000000e+00> : vector<8x128xf32>
    %9 = tpu.matmul %7, %8, %cst_8 {dimension_numbers = #tpu.dot_dimension_numbers<[1], [0], [0], [1], [0, 0, 1, 1], [], []>} : vector<8x256xf32>, vector<256x128xf32>, vector<8x128xf32> -> vector<8x128xf32>
    %c0_9 = arith.constant 0 : index
    %c0_10 = arith.constant 0 : index
    %10 = vector.load %arg5[%c0_9, %c0_10] : memref<1x128xf32, #tpu.memory_space<vmem>>, vector<1x128xf32>
    %11 = vector.broadcast %10 : vector<1x128xf32> to vector<8x128xf32>
    %12 = arith.addf %9, %11 : vector<8x128xf32>
    %c0_11 = arith.constant 0 : index
    %c0_12 = arith.constant 0 : index
    %13 = vector.load %arg6[%c0_11, %c0_12] : memref<8x128xf32, #tpu.memory_space<vmem>>, vector<8x128xf32>
    tpu.vector_store %arg6[%c0_11, %c0_12], %12 {strides = array<i32>} : memref<8x128xf32, #tpu.memory_space<vmem>>, vector<8x128xf32>,
    return
  }
  func.func @transform_0(%arg0: i32) -> (i32, i32) {
    %c0_i32 = arith.constant 0 : i32
    %c0_i32_0 = arith.constant 0 : i32
    return %arg0, %c0_i32 : i32, i32
  }
  func.func @transform_1(%arg0: i32) -> (i32, i32) {
    %c0_i32 = arith.constant 0 : i32
    %c0_i32_0 = arith.constant 0 : i32
    %c0_i32_1 = arith.constant 0 : i32
    return %c0_i32, %c0_i32_0 : i32, i32
  }
  func.func @transform_2(%arg0: i32) -> (i32, i32) {
    %c0_i32 = arith.constant 0 : i32
    %c0_i32_0 = arith.constant 0 : i32
    %c0_i32_1 = arith.constant 0 : i32
    return %c0_i32, %c0_i32_0 : i32, i32
  }
  func.func @transform_3(%arg0: i32) -> (i32, i32) {
    %c0_i32 = arith.constant 0 : i32
    %c0_i32_0 = arith.constant 0 : i32
    %c0_i32_1 = arith.constant 0 : i32
    return %c0_i32, %c0_i32_0 : i32, i32
  }
  func.func @transform_4(%arg0: i32) -> (i32, i32) {
    %c0_i32 = arith.constant 0 : i32
    %c0_i32_0 = arith.constant 0 : i32
    %c0_i32_1 = arith.constant 0 : i32
    return %c0_i32, %c0_i32_0 : i32, i32
  }
  func.func @transform_5(%arg0: i32) -> (i32, i32) {
    %c0_i32 = arith.constant 0 : i32
    %c0_i32_0 = arith.constant 0 : i32
    return %arg0, %c0_i32 : i32, i32
  }
}

</mosaic_0001>

<bundles_post_ra>
// kernel: tpu_custom_call.1
= control target key start
LH: loop header
LB: loop body
LE: loop exit
PB: predicated region body
PF: predicated region fallthrough
CT: control target
= control target key end

     0   :  { %10 = vsyncpa [#allocation3], 0  ;;  %s430_s0 = inlined_call_operand.hbm [shape: f32[8,16], index: 0, kind: input, shape index: {}]   ;;  %s431_s1 = inlined_call_operand.hbm [shape: f32[16,256], index: 1, kind: input, shape index: {}]   ;;  %s432_s2 = inlined_call_operand.hbm [shape: f32[1,256], index: 2, kind: input, shape index: {}]   ;;  %s433_s3 = inlined_call_operand.hbm [shape: f32[256,128], index: 3, kind: input, shape index: {}]   ;;  %s434_s4 = inlined_call_operand.vmem [shape: f32[1,128], index: 4, kind: input, shape index: {}]   ;;  %s435_s5 = inlined_call_operand.hbm [shape: f32[8,128], index: 5, kind: output, shape index: {}]  }
   0x1   :  { %11 = vsyncpa [#allocation6], 0 }
   0x2   :  { %12 = vsyncpa [#allocation9], 0  ;;  %s29_s20 = sshll.u32 %s431_s1, 4  ;;  %s30_s20 = int_to_ptr.hbm [resolvable:$true] %s29_s20 }
   0x3   :  { %13 = vsyncpa [#allocation4], 0  ;;  %s373_s21 = smov [#allocation5]   ;;  %s19_s25 = sshll.u32 %s430_s0, 4  ;;  %s20_s25 = int_to_ptr.hbm [resolvable:$true] %s19_s25 }
   0x4   :  { %s31_s22 = sshll.u32 %s373_s21, 4  ;;  %s374_s26 = smov 256   ;;  %s32_s22 = int_to_ptr.vmem [resolvable:$true] %s31_s22 }
   0x5   :  { %s375_s27 = smov 16   ;;  %s376_s28 = smov [#allocation2]  }
   0x6   :  { %37 = dma.hbm_to_vmem [thread:$0]  %s30_s20, 512, %s32_s22, [#allocation6], %s374_s26, %s374_s26, %s375_s27  }
   0x7   :  { %s21_s29 = sshll.u32 %s376_s28, 4  ;;  %s43_s7 = sshll.u32 %s432_s2, 4  ;;  %s22_s29 = int_to_ptr.vmem [resolvable:$true] %s21_s29  ;;  %s44_s7 = int_to_ptr.hbm [resolvable:$true] %s43_s7 }
   0x8   :  { %24 = dma.hbm_to_vmem [thread:$0]  %s20_s25, 128, %s22_s29, [#allocation3]  }
   0x9   :  { %s53_s9 = sshll.u32 %s433_s3, 4  ;;  %s377_s10 = smov [#allocation7]   ;;  %s54_s9 = int_to_ptr.hbm [resolvable:$true] %s53_s9 }
   0xa   :  { %s45_s11 = sshll.u32 %s377_s10, 4  ;;  %s378_s0 = smov [#allocation8]   ;;  %s46_s11 = int_to_ptr.vmem [resolvable:$true] %s45_s11 }
   0xb   :  { %48 = dma.hbm_to_vmem [thread:$0]  %s44_s7, 32, %s46_s11, [#allocation6]  }
   0xc   :  { %s55_s12 = sshll.u32 %s378_s0, 4  ;;  %s379_s13 = smov 128   ;;  %s56_s12 = int_to_ptr.vmem [resolvable:$true] %s55_s12 }
   0xd   :  { %s380_s14 = smov 8  }
   0xe   :  { %61 = dma.hbm_to_vmem [thread:$0]  %s54_s9, 4096, %s56_s12, [#allocation9], %s379_s13, %s379_s13, %s380_s14  }
   0xf   :  { %365 = dma.done.wait [#allocation3], 128  }
  0x10   :  { %366 = vsyncadd [#allocation3], 4294967168 }
  0x11   :  { %367 = dma.done.wait [#allocation6], 544  }
  0x12   :  { %368 = vsyncadd [#allocation6], 4294966752 }
  0x13   :  { %369 = dma.done.wait [#allocation9], 4096  }
  0x14   :  { %370 = vsyncadd [#allocation9], 4294963200  ;;  %v83_v0 = vld [vmem:[#allocation5 + $0x10] sm:$0xff]  ;;  %v81_v1 = vld [vmem:[#allocation5] sm:$0xff]  ;;  %vm91_vm0 = vcmask 130048   ;;  %s381_s15 = smov [#allocation10]  }
  0x15   :  { %v84_v2 = vld [vmem:[#allocation5 + $0x18] sm:$0xff]  ;;  %109 = vmatpush.msra.mxu0 %v83_v0  ;;  %v82_v4 = vld [vmem:[#allocation5 + $0x8] sm:$0xff]  ;;  %v85_v37 = vld [vmem:[#allocation7] sm:$0x3]  ;;  %s219_s16 = sshll.u32 %s381_s15, 4  ;;  %s221_s19 = sshll.u32 %s435_s5, 4  ;;  %s220_s16 = int_to_ptr.vmem [resolvable:$true] %s219_s16  ;;  %s222_s19 = int_to_ptr.hbm [resolvable:$true] %s221_s19 }
  0x16   :  { %129 = vmatpush.msra.mxu1 %v84_v2  ;;  %v80_v3 = vld [vmem:[#allocation2] sm:$0xff]  ;;  %v150_v8 = vld [vmem:[#allocation8 + $0x68] sm:$0xff]  ;;  %v149_v10 = vld [vmem:[#allocation8 + $0x60] sm:$0xff]  ;;  %v87_v38 = vperm.slane %v85_v37, 0  ;;  %v88_v39 = vperm.slane %v85_v37, 1 }
  0x17   :  { %v152_v5 = vld [vmem:[#allocation8 + $0x78] sm:$0xff]  ;;  %v151_v6 = vld [vmem:[#allocation8 + $0x70] sm:$0xff]  ;;  %110 = vmatpush.msra.mxu0 %v81_v1  ;;  %v166_v11 = vld [vmem:[#allocation8 + $0xe8] sm:$0xff] }
  0x18   :  { %173 = vmatpush.msra.mxu2 %v152_v5  ;;  %v168_v7 = vld [vmem:[#allocation8 + $0xf8] sm:$0xff]  ;;  %130 = vmatpush.msra.mxu1 %v82_v4  ;;  %v167_v9 = vld [vmem:[#allocation8 + $0xf0] sm:$0xff]  ;;  %v165_v13 = vld [vmem:[#allocation8 + $0xe0] sm:$0xff] }
  0x19   :  { %233 = vmatmul.msk.f32.vlgmr.msra.gmra.mxu0 %vm91_vm0, %v80_v3  ;;  %234 = vmatmul.msk.f32.vlgmr.msra.gmra.mxu1 %vm91_vm0, %v80_v3  ;;  %v148_v12 = vld [vmem:[#allocation8 + $0x58] sm:$0xff]  ;;  %v147_v14 = vld [vmem:[#allocation8 + $0x50] sm:$0xff]  ;;  %v146_v16 = vld [vmem:[#allocation8 + $0x48] sm:$0xff] }
  0x1a   :  { %174 = vmatpush.msra.mxu2 %v151_v6  ;;  %193 = vmatpush.msra.mxu3 %v168_v7  ;;  %v164_v15 = vld [vmem:[#allocation8 + $0xd8] sm:$0xff]  ;;  %v163_v17 = vld [vmem:[#allocation8 + $0xd0] sm:$0xff]  ;;  %v145_v18 = vld [vmem:[#allocation8 + $0x40] sm:$0xff] }
  0x1b   :  { %v162_v19 = vld [vmem:[#allocation8 + $0xc8] sm:$0xff]  ;;  %v144_v20 = vld [vmem:[#allocation8 + $0x38] sm:$0xff]  ;;  %v161_v21 = vld [vmem:[#allocation8 + $0xc0] sm:$0xff] }
  0x1c   :  { %175 = vmatpush.msra.mxu2 %v150_v8  ;;  %194 = vmatpush.msra.mxu3 %v167_v9  ;;  %v143_v22 = vld [vmem:[#allocation8 + $0x30] sm:$0xff]  ;;  %v160_v23 = vld [vmem:[#allocation8 + $0xb8] sm:$0xff]  ;;  %v142_v24 = vld [vmem:[#allocation8 + $0x28] sm:$0xff] }
  0x1d   :  { %v159_v25 = vld [vmem:[#allocation8 + $0xb0] sm:$0xff]  ;;  %v141_v26 = vld [vmem:[#allocation8 + $0x20] sm:$0xff]  ;;  %v158_v27 = vld [vmem:[#allocation8 + $0xa8] sm:$0xff] }
  0x1e   :  { %176 = vmatpush.msra.mxu2 %v149_v10  ;;  %195 = vmatpush.msra.mxu3 %v166_v11  ;;  %v140_v28 = vld [vmem:[#allocation8 + $0x18] sm:$0xff]  ;;  %v157_v29 = vld [vmem:[#allocation8 + $0xa0] sm:$0xff]  ;;  %v139_v30 = vld [vmem:[#allocation8 + $0x10] sm:$0xff] }
  0x1f   :  { %v156_v31 = vld [vmem:[#allocation8 + $0x98] sm:$0xff]  ;;  %v138_v32 = vld [vmem:[#allocation8 + $0x8] sm:$0xff]  ;;  %v155_v33 = vld [vmem:[#allocation8 + $0x90] sm:$0xff] }
  0x20   :  { %177 = vmatpush.msra.mxu2 %v148_v12  ;;  %196 = vmatpush.msra.mxu3 %v165_v13  ;;  %v137_v34 = vld [vmem:[#allocation8] sm:$0xff]  ;;  %v154_v35 = vld [vmem:[#allocation8 + $0x88] sm:$0xff]  ;;  %v244_v46 = vld [vmem:[%s434_s4] ss:$0 sm:$0xff] }
  0x21   :  { %v153_v36 = vld [vmem:[#allocation8 + $0x80] sm:$0xff] }
  0x22   :  { %178 = vmatpush.msra.mxu2 %v147_v14  ;;  %197 = vmatpush.msra.mxu3 %v164_v15 }
  0x24   :  { %179 = vmatpush.msra.mxu2 %v146_v16  ;;  %198 = vmatpush.msra.mxu3 %v163_v17 }
  0x26   :  { %180 = vmatpush.msra.mxu2 %v145_v18  ;;  %199 = vmatpush.msra.mxu3 %v162_v19 }
  0x28   :  { %181 = vmatpush.msra.mxu2 %v144_v20  ;;  %200 = vmatpush.msra.mxu3 %v161_v21 }
  0x2a   :  { %182 = vmatpush.msra.mxu2 %v143_v22  ;;  %201 = vmatpush.msra.mxu3 %v160_v23 }
  0x2c   :  { %183 = vmatpush.msra.mxu2 %v142_v24  ;;  %202 = vmatpush.msra.mxu3 %v159_v25 }
  0x2e   :  { %184 = vmatpush.msra.mxu2 %v141_v26  ;;  %203 = vmatpush.msra.mxu3 %v158_v27 }
  0x30   :  { %185 = vmatpush.msra.mxu2 %v140_v28  ;;  %204 = vmatpush.msra.mxu3 %v157_v29 }
  0x32   :  { %186 = vmatpush.msra.mxu2 %v139_v30  ;;  %205 = vmatpush.msra.mxu3 %v156_v31 }
  0x34   :  { %187 = vmatpush.msra.mxu2 %v138_v32  ;;  %206 = vmatpush.msra.mxu3 %v155_v33 }
  0x36   :  { %188 = vmatpush.msra.mxu2 %v137_v34  ;;  %207 = vmatpush.msra.mxu3 %v154_v35 }
  0x38   :  { %208 = vmatpush.msra.mxu3 %v153_v36 }
  0x96   :  { %v112_v40 = vpop.f32.mrf.mxu0  ;;  %v132_v41 = vpop.f32.mrf.mxu1 }
  0x97   :  { %v113_v42 = vadd.f32 %v112_v40, %v87_v38  ;;  %v133_v43 = vadd.f32 %v132_v41, %v88_v39 }
  0x99   :  { %v135_v44 = vmax.f32 %v113_v42, 0.0  ;;  %v136_v45 = vmax.f32 %v133_v43, 0.0 }
  0x9b   :  { %189 = vmatmul.f32.vlgmr.msra.gmra.mxu2 %v135_v44  ;;  %209 = vmatmul.f32.vlgmr.msra.gmra.mxu3 %v136_v45 }
 0x11e   :  { %v190_v47 = vpop.f32.mrf.mxu2  ;;  %v210_v48 = vpop.f32.mrf.mxu3 }
 0x11f   :  { %v191_v49 = vadd.f32 %v244_v46, %v190_v47 }
 0x121   :  { %v211_v50 = vadd.f32 %v210_v48, %v191_v49 }
 0x123   :  { %213 = vst [vmem:[#allocation10] sm:$0xff] %v211_v50 }
 0x124   :  { %224 = dma.vmem_to_hbm [thread:$0]  %s220_s16, 128, %s222_s19, [#allocation4]  }
 0x125   :  { %371 = dma.done.wait [#allocation4], 128  }
 0x126   :  { %372 = vsyncadd [#allocation4], 4294967168 }
 0x127   :  { %229 = vsyncpa [#allocation3], 1 }
 0x128   :  { %230 = vsyncpa [#allocation6], 1 }
 0x129   :  { %231 = vsyncpa [#allocation9], 1 }
 0x12a   :  { %232 = vsyncpa [#allocation4], 1 }

</bundles_post_ra>
